<compile_context>
chip_gen: v6e
topology: v6e:2x2x1
jax: 0.10.0
libtpu: 0.0.40
codegen_flags: <defaults>
</compile_context>

<pallas_src>
import jax
import jax.numpy as jnp
from jax.experimental import pallas as pl
from jax.experimental.pallas import tpu as pltpu

_EPS = 1e-5


# ----------------------------- Pallas kernel ------------------------------- #

def _layernorm_kernel(x_ref, w_ref, b_ref, o_ref):
    """x_ref: (TR, C) rows; w_ref/b_ref: (1, C); o_ref: (TR, C)."""
    x = x_ref[...]
    mu = jnp.mean(x, axis=-1, keepdims=True)          # per-row mean
    xc = x - mu
    var = jnp.mean(xc * xc, axis=-1, keepdims=True)   # biased variance
    inv = jax.lax.rsqrt(var + _EPS)
    o_ref[...] = (xc * inv) * w_ref[...] + b_ref[...]


# ----------------------------- pallas_call wrapper -------------------------- #

def with_bias_layernorm(x, weight, bias, *, block_rows=256):
    """LayerNorm over the last dim of x (any rank >= 1) with affine weight/bias."""
    orig_shape = x.shape
    orig_dtype = x.dtype
    C = orig_shape[-1]

    R = 1
    for d in orig_shape[:-1]:
        R *= d
    x2 = x.reshape(R, C).astype(jnp.float32)

    br = max(8, min(block_rows, R))
    br = ((br + 7) // 8) * 8                 # sublane-aligned row tile
    n_blocks = pl.cdiv(R, br)
    Rp = n_blocks * br
    if Rp != R:
        # Zero-padded rows normalize to finite garbage and are sliced off below.
        x2 = jnp.pad(x2, ((0, Rp - R), (0, 0)))

    w2 = weight.reshape(1, C).astype(jnp.float32)
    b2 = bias.reshape(1, C).astype(jnp.float32)

    out = pl.pallas_call(
        _layernorm_kernel,
        out_shape=jax.ShapeDtypeStruct((Rp, C), jnp.float32),
        grid=(n_blocks,),
        in_specs=[
            pl.BlockSpec((br, C), lambda i: (i, 0)),   # row tile of x
            pl.BlockSpec((1, C), lambda i: (0, 0)),    # weight (broadcast)
            pl.BlockSpec((1, C), lambda i: (0, 0)),    # bias (broadcast)
        ],
        out_specs=pl.BlockSpec((br, C), lambda i: (i, 0)),
        compiler_params=pltpu.CompilerParams(
            dimension_semantics=("parallel",)),        # rows independent -> both TCs on v7x
    )(x2, w2, b2)

    if Rp != R:
        out = out[:R]
    return out.reshape(orig_shape).astype(orig_dtype)


# ----------------------------- pure-JAX reference --------------------------- #

def _layernorm_ref(x, w, b):
    mu = jnp.mean(x, axis=-1, keepdims=True)
    var = jnp.mean(jnp.square(x - mu), axis=-1, keepdims=True)
    return (x - mu) / jnp.sqrt(var + _EPS) * w + b


if __name__ == "__main__":
    key = jax.random.PRNGKey(0)
    kx, kw, kb = jax.random.split(key, 3)

    # Typical use in networkDAMF: x is (B, H*W, C) tokens; keep it small.
    B, L, C = 2, 256, 64
    x = jax.random.normal(kx, (B, L, C), jnp.float32)
    weight = jnp.ones((C,), jnp.float32) + 0.1 * jax.random.normal(kw, (C,), jnp.float32)
    bias = 0.1 * jax.random.normal(kb, (C,), jnp.float32)

    fwd = jax.jit(with_bias_layernorm)
    y = fwd(x, weight, bias)
    jax.block_until_ready(y)

    y_ref = _layernorm_ref(x, weight, bias)
    assert y.shape == x.shape, y.shape
    assert y.dtype == jnp.float32, y.dtype
    max_err = float(jnp.max(jnp.abs(y - y_ref)))
    assert max_err < 1e-4, max_err

    print("KERNEL_OK")
</pallas_src>

<mosaic_0001>
module attributes {stable_mosaic.version = 11 : i64} {
  func.func @_layernorm_kernel(%arg0: i32, %arg1: memref<256x64xf32, #tpu.memory_space<vmem>>, %arg2: memref<1x64xf32, #tpu.memory_space<vmem>>, %arg3: memref<1x64xf32, #tpu.memory_space<vmem>>, %arg4: memref<256x64xf32, #tpu.memory_space<vmem>>) attributes {dimension_semantics = [#tpu.dimension_semantics<parallel>], iteration_bounds = array<i64: 2>, scalar_prefetch = 0 : i64, scratch_operands = 0 : i64, tpu.core_type = #tpu.core_type<tc>, window_params = [{transform_indices = @transform_0, window_bounds = array<i64: 256, 64>}, {pipeline_mode = #tpu.pipeline_mode<synchronous>, transform_indices = @transform_1, window_bounds = array<i64: 1, 64>}, {pipeline_mode = #tpu.pipeline_mode<synchronous>, transform_indices = @transform_2, window_bounds = array<i64: 1, 64>}, {transform_indices = @transform_3, window_bounds = array<i64: 256, 64>}]} {
    %c0 = arith.constant 0 : index
    %c0_0 = arith.constant 0 : index
    %0 = vector.load %arg1[%c0, %c0_0] : memref<256x64xf32, #tpu.memory_space<vmem>>, vector<256x64xf32>
    %cst = arith.constant dense<0.000000e+00> : vector<256xf32>
    %1 = vector.multi_reduction <add>, %0, %cst [1] : vector<256x64xf32> to vector<256xf32>
    %2 = vector.shape_cast %1 : vector<256xf32> to vector<256x1xf32>
    %cst_1 = arith.constant 6.400000e+01 : f32
    %3 = vector.broadcast %cst_1 : f32 to vector<256x1xf32>
    %4 = arith.divf %2, %3 : vector<256x1xf32>
    %5 = vector.broadcast %4 : vector<256x1xf32> to vector<256x64xf32>
    %6 = arith.subf %0, %5 : vector<256x64xf32>
    %7 = arith.mulf %6, %6 : vector<256x64xf32>
    %cst_2 = arith.constant dense<0.000000e+00> : vector<256xf32>
    %8 = vector.multi_reduction <add>, %7, %cst_2 [1] : vector<256x64xf32> to vector<256xf32>
    %9 = vector.shape_cast %8 : vector<256xf32> to vector<256x1xf32>
    %cst_3 = arith.constant 6.400000e+01 : f32
    %10 = vector.broadcast %cst_3 : f32 to vector<256x1xf32>
    %11 = arith.divf %9, %10 : vector<256x1xf32>
    %cst_4 = arith.constant 9.99999974E-6 : f32
    %12 = vector.broadcast %cst_4 : f32 to vector<256x1xf32>
    %13 = arith.addf %11, %12 : vector<256x1xf32>
    %14 = math.rsqrt %13 : vector<256x1xf32>
    %15 = vector.broadcast %14 : vector<256x1xf32> to vector<256x64xf32>
    %16 = arith.mulf %6, %15 : vector<256x64xf32>
    %c0_5 = arith.constant 0 : index
    %c0_6 = arith.constant 0 : index
    %17 = vector.load %arg2[%c0_5, %c0_6] : memref<1x64xf32, #tpu.memory_space<vmem>>, vector<1x64xf32>
    %18 = vector.broadcast %17 : vector<1x64xf32> to vector<256x64xf32>
    %19 = arith.mulf %16, %18 : vector<256x64xf32>
    %c0_7 = arith.constant 0 : index
    %c0_8 = arith.constant 0 : index
    %20 = vector.load %arg3[%c0_7, %c0_8] : memref<1x64xf32, #tpu.memory_space<vmem>>, vector<1x64xf32>
    %21 = vector.broadcast %20 : vector<1x64xf32> to vector<256x64xf32>
    %22 = arith.addf %19, %21 : vector<256x64xf32>
    %c0_9 = arith.constant 0 : index
    %c0_10 = arith.constant 0 : index
    %23 = vector.load %arg4[%c0_9, %c0_10] : memref<256x64xf32, #tpu.memory_space<vmem>>, vector<256x64xf32>
    tpu.vector_store %arg4[%c0_9, %c0_10], %22 {strides = array<i32>} : memref<256x64xf32, #tpu.memory_space<vmem>>, vector<256x64xf32>,
    return
  }
  func.func @transform_0(%arg0: i32) -> (i32, i32) {
    %c0_i32 = arith.constant 0 : i32
    %c0_i32_0 = arith.constant 0 : i32
    return %arg0, %c0_i32 : i32, i32
  }
  func.func @transform_1(%arg0: i32) -> (i32, i32) {
    %c0_i32 = arith.constant 0 : i32
    %c0_i32_0 = arith.constant 0 : i32
    %c0_i32_1 = arith.constant 0 : i32
    return %c0_i32, %c0_i32_0 : i32, i32
  }
  func.func @transform_2(%arg0: i32) -> (i32, i32) {
    %c0_i32 = arith.constant 0 : i32
    %c0_i32_0 = arith.constant 0 : i32
    %c0_i32_1 = arith.constant 0 : i32
    return %c0_i32, %c0_i32_0 : i32, i32
  }
  func.func @transform_3(%arg0: i32) -> (i32, i32) {
    %c0_i32 = arith.constant 0 : i32
    %c0_i32_0 = arith.constant 0 : i32
    return %arg0, %c0_i32 : i32, i32
  }
}

</mosaic_0001>

<bundles_post_ra>
// kernel: with_bias_layernorm.1
= control target key start
LH: loop header
LB: loop body
LE: loop exit
PB: predicated region body
PF: predicated region fallthrough
CT: control target
= control target key end

     0   :  { %s903_s12 = smov 0   ;;  %s1453_s0 = inlined_call_operand.vmem [shape: f32[512,64], index: 0, kind: input, shape index: {}]   ;;  %s1454_s1 = inlined_call_operand.vmem [shape: f32[1,64], index: 1, kind: input, shape index: {}]   ;;  %s1455_s2 = inlined_call_operand.vmem [shape: f32[1,64], index: 2, kind: input, shape index: {}]   ;;  %s1456_s3 = inlined_call_operand.vmem [shape: f32[512,64], index: 3, kind: output, shape index: {}]  }
   0x1 LB: > { %s790_s13 = sadd.s32 4294967295, %s881_s12   ;;  %p794_p0 = scmp.ge.s32.totalorder %s881_s12, 1  ;;  %s881_s12 = sphi %s903_s12, %s13_s12  }
   0x2   : > { %p138_p1 = scmp.lt.s32.totalorder %s881_s12, 3 }
   0x4   : > { %p139_p2 = pnand %p794_p0, %p138_p1 }
   0x5   : > { %s795_s14 = sshll.u32 (!%p139_p2), %s790_s13, 5 }
   0x6   : > { %142 = sbr.rel (%p139_p2) target bundleno = 388 (0x184), region = 32  ;;  %p163_p3 = scmp.lt.s32.totalorder (!%p139_p2), %s795_s14, 63 }
   0xb   : > { %s1458_s14 = smov (!%p163_p3, %s795_s14), 63  ;;  %vm206_vm0 = vcmask 523264  }
   0xc   : > { %s796_s15 = sshll.u32 %s1458_s14, 3 }
   0xd   : > { %s919_s18 = scalar_lea.vmem %s1453_s0, %s796_s15  ;;  %s1290_s25 = scalar_lea.vmem %s1456_s3, %s796_s15 }
   0xe   : > { %v922_v0 = vld [vmem:[%s919_s18] sm:$0xff]  ;;  %v925_v1 = vld [vmem:[%s919_s18 + $0x10] sm:$0xff]  ;;  %v928_v2 = vld [vmem:[%s919_s18 + $0x8] sm:$0xff] }
   0xf   : > { %v207_v3 = vsel %vm206_vm0, %v922_v0, 0.0  ;;  %v213_v4 = vsel %vm206_vm0, %v925_v1, 0.0  ;;  %v935_v5 = vld [vmem:[%s919_s18 + $0x18] sm:$0xff]  ;;  %v210_v6 = vsel %vm206_vm0, %v928_v2, 0.0  ;;  %v942_v8 = vld [vmem:[%s919_s18 + $0x20] sm:$0xff]  ;;  %v945_v9 = vld [vmem:[%s919_s18 + $0x28] sm:$0xff] }
  0x10   : > { %208 = vadd.xlane.f32.xlu0 %v207_v3  ;;  %214 = vadd.xlane.f32.xlu1 %v213_v4  ;;  %v216_v7 = vsel %vm206_vm0, %v935_v5, 0.0  ;;  %v219_v10 = vsel %vm206_vm0, %v942_v8, 0.0  ;;  %v222_v11 = vsel %vm206_vm0, %v945_v9, 0.0  ;;  %v952_v12 = vld [vmem:[%s919_s18 + $0x30] sm:$0xff]  ;;  %v955_v13 = vld [vmem:[%s919_s18 + $0x38] sm:$0xff]  ;;  %v962_v16 = vld [vmem:[%s919_s18 + $0x40] sm:$0xff] }
  0x11   : > { %v225_v14 = vsel %vm206_vm0, %v952_v12, 0.0  ;;  %v228_v15 = vsel %vm206_vm0, %v955_v13, 0.0  ;;  %v965_v17 = vld [vmem:[%s919_s18 + $0x48] sm:$0xff]  ;;  %v231_v18 = vsel %vm206_vm0, %v962_v16, 0.0  ;;  %v972_v20 = vld [vmem:[%s919_s18 + $0x50] sm:$0xff]  ;;  %v975_v21 = vld [vmem:[%s919_s18 + $0x58] sm:$0xff] }
  0x12   : > { %v234_v19 = vsel %vm206_vm0, %v965_v17, 0.0  ;;  %v237_v22 = vsel %vm206_vm0, %v972_v20, 0.0  ;;  %v240_v23 = vsel %vm206_vm0, %v975_v21, 0.0  ;;  %v982_v24 = vld [vmem:[%s919_s18 + $0x60] sm:$0xff]  ;;  %v985_v25 = vld [vmem:[%s919_s18 + $0x68] sm:$0xff]  ;;  %v992_v28 = vld [vmem:[%s919_s18 + $0x70] sm:$0xff] }
  0x13   : > { %v243_v26 = vsel %vm206_vm0, %v982_v24, 0.0  ;;  %v246_v27 = vsel %vm206_vm0, %v985_v25, 0.0  ;;  %v995_v29 = vld [vmem:[%s919_s18 + $0x78] sm:$0xff]  ;;  %v249_v30 = vsel %vm206_vm0, %v992_v28, 0.0  ;;  %v1002_v32 = vld [vmem:[%s919_s18 + $0x80] sm:$0xff]  ;;  %v1005_v33 = vld [vmem:[%s919_s18 + $0x88] sm:$0xff] }
  0x14   : > { %211 = vadd.xlane.f32.xlu0 %v210_v6  ;;  %217 = vadd.xlane.f32.xlu1 %v216_v7  ;;  %v252_v31 = vsel %vm206_vm0, %v995_v29, 0.0  ;;  %v255_v34 = vsel %vm206_vm0, %v1002_v32, 0.0  ;;  %v258_v35 = vsel %vm206_vm0, %v1005_v33, 0.0  ;;  %v1012_v36 = vld [vmem:[%s919_s18 + $0x90] sm:$0xff]  ;;  %v1015_v37 = vld [vmem:[%s919_s18 + $0x98] sm:$0xff]  ;;  %v1022_v40 = vld [vmem:[%s919_s18 + $0xa0] sm:$0xff] }
  0x15   : > { %v261_v38 = vsel %vm206_vm0, %v1012_v36, 0.0  ;;  %v264_v39 = vsel %vm206_vm0, %v1015_v37, 0.0  ;;  %v1025_v41 = vld [vmem:[%s919_s18 + $0xa8] sm:$0xff]  ;;  %v267_v42 = vsel %vm206_vm0, %v1022_v40, 0.0  ;;  %v1032_v44 = vld [vmem:[%s919_s18 + $0xb0] sm:$0xff]  ;;  %v1035_v45 = vld [vmem:[%s919_s18 + $0xb8] sm:$0xff] }
  0x16   : > { %v270_v43 = vsel %vm206_vm0, %v1025_v41, 0.0  ;;  %v273_v46 = vsel %vm206_vm0, %v1032_v44, 0.0  ;;  %v276_v47 = vsel %vm206_vm0, %v1035_v45, 0.0  ;;  %v1042_v48 = vld [vmem:[%s919_s18 + $0xc0] sm:$0xff]  ;;  %v1045_v49 = vld [vmem:[%s919_s18 + $0xc8] sm:$0xff]  ;;  %v1052_v52 = vld [vmem:[%s919_s18 + $0xd0] sm:$0xff] }
  0x17   : > { %v279_v50 = vsel %vm206_vm0, %v1042_v48, 0.0  ;;  %v282_v51 = vsel %vm206_vm0, %v1045_v49, 0.0  ;;  %v1055_v53 = vld [vmem:[%s919_s18 + $0xd8] sm:$0xff]  ;;  %v285_v54 = vsel %vm206_vm0, %v1052_v52, 0.0  ;;  %v1062_v56 = vld [vmem:[%s919_s18 + $0xe0] sm:$0xff]  ;;  %v1065_v57 = vld [vmem:[%s919_s18 + $0xe8] sm:$0xff] }
  0x18   : > { %220 = vadd.xlane.f32.xlu0 %v219_v10  ;;  %223 = vadd.xlane.f32.xlu1 %v222_v11  ;;  %v288_v55 = vsel %vm206_vm0, %v1055_v53, 0.0  ;;  %v291_v58 = vsel %vm206_vm0, %v1062_v56, 0.0  ;;  %v294_v59 = vsel %vm206_vm0, %v1065_v57, 0.0  ;;  %v1072_v60 = vld [vmem:[%s919_s18 + $0xf0] sm:$0xff]  ;;  %v1075_v61 = vld [vmem:[%s919_s18 + $0xf8] sm:$0xff] }
  0x19   : > { %v297_v62 = vsel %vm206_vm0, %v1072_v60, 0.0  ;;  %v300_v63 = vsel %vm206_vm0, %v1075_v61, 0.0 }
  0x1c   : > { %226 = vadd.xlane.f32.xlu0 %v225_v14  ;;  %229 = vadd.xlane.f32.xlu1 %v228_v15 }
  0x20   : > { %232 = vadd.xlane.f32.xlu0 %v231_v18  ;;  %235 = vadd.xlane.f32.xlu1 %v234_v19 }
  0x24   : > { %238 = vadd.xlane.f32.xlu0 %v237_v22  ;;  %241 = vadd.xlane.f32.xlu1 %v240_v23 }
  0x28   : > { %244 = vadd.xlane.f32.xlu0 %v243_v26  ;;  %247 = vadd.xlane.f32.xlu1 %v246_v27 }
  0x2c   : > { %250 = vadd.xlane.f32.xlu0 %v249_v30  ;;  %253 = vadd.xlane.f32.xlu1 %v252_v31 }
  0x30   : > { %256 = vadd.xlane.f32.xlu0 %v255_v34  ;;  %259 = vadd.xlane.f32.xlu1 %v258_v35 }
  0x34   : > { %262 = vadd.xlane.f32.xlu0 %v261_v38  ;;  %265 = vadd.xlane.f32.xlu1 %v264_v39 }
  0x38   : > { %268 = vadd.xlane.f32.xlu0 %v267_v42  ;;  %271 = vadd.xlane.f32.xlu1 %v270_v43 }
  0x3c   : > { %274 = vadd.xlane.f32.xlu0 %v273_v46  ;;  %277 = vadd.xlane.f32.xlu1 %v276_v47 }
  0x40   : > { %280 = vadd.xlane.f32.xlu0 %v279_v50  ;;  %283 = vadd.xlane.f32.xlu1 %v282_v51 }
  0x44   : > { %286 = vadd.xlane.f32.xlu0 %v285_v54  ;;  %289 = vadd.xlane.f32.xlu1 %v288_v55 }
  0x48   : > { %292 = vadd.xlane.f32.xlu0 %v291_v58  ;;  %295 = vadd.xlane.f32.xlu1 %v294_v59 }
  0x4c   : > { %298 = vadd.xlane.f32.xlu0 %v297_v62  ;;  %301 = vadd.xlane.f32.xlu1 %v300_v63 }
  0x99   : > { %v209_v3 = vpop.xlane.xlu0 %208  ;;  %v215_v4 = vpop.xlane.xlu1 %214 }
  0x9a   : > { %v304_v6 = vmul.f32 0.015625, %v209_v3  ;;  %v306_v7 = vmul.f32 0.015625, %v215_v4 }
  0x9c   : > { %v1082_v10 = vsub.f32 %v922_v0, %v304_v6  ;;  %v1085_v11 = vsub.f32 %v925_v1, %v306_v7 }
  0x9d   : > { %v212_v14 = vpop.xlane.xlu0 %211  ;;  %v218_v15 = vpop.xlane.xlu1 %217 }
  0x9e   : > { %v305_v18 = vmul.f32 0.015625, %v212_v14  ;;  %v307_v19 = vmul.f32 0.015625, %v218_v15  ;;  %v368_v22 = vmul.f32 %v1082_v10, %v1082_v10  ;;  %v370_v23 = vmul.f32 %v1085_v11, %v1085_v11 }
  0xa0   : > { %v1092_v26 = vsub.f32 %v928_v2, %v305_v18  ;;  %v1095_v27 = vsub.f32 %v935_v5, %v307_v19  ;;  %v400_v0 = vsel %vm206_vm0, %v368_v22, 0.0  ;;  %v406_v31 = vsel %vm206_vm0, %v370_v23, 0.0 }
  0xa1   : > { %401 = vadd.xlane.f32.xlu0 %v400_v0  ;;  %v221_v1 = vpop.xlane.xlu0 %220  ;;  %v224_v30 = vpop.xlane.xlu1 %223 }
  0xa2   : > { %v308_v34 = vmul.f32 0.015625, %v221_v1  ;;  %v309_v35 = vmul.f32 0.015625, %v224_v30  ;;  %v369_v38 = vmul.f32 %v1092_v26, %v1092_v26  ;;  %v371_v39 = vmul.f32 %v1095_v27, %v1095_v27 }
  0xa4   : > { %v1104_v2 = vsub.f32 %v942_v8, %v308_v34  ;;  %v1107_v5 = vsub.f32 %v945_v9, %v309_v35  ;;  %v403_v42 = vsel %vm206_vm0, %v369_v38, 0.0  ;;  %v409_v47 = vsel %vm206_vm0, %v371_v39, 0.0 }
  0xa5   : > { %407 = vadd.xlane.f32.xlu0 %v406_v31  ;;  %404 = vadd.xlane.f32.xlu1 %v403_v42  ;;  %v227_v43 = vpop.xlane.xlu0 %226  ;;  %v230_v46 = vpop.xlane.xlu1 %229 }
  0xa6   : > { %v310_v50 = vmul.f32 0.015625, %v227_v43  ;;  %v311_v51 = vmul.f32 0.015625, %v230_v46  ;;  %v372_v54 = vmul.f32 %v1104_v2, %v1104_v2  ;;  %v373_v8 = vmul.f32 %v1107_v5, %v1107_v5 }
  0xa8   : > { %v1116_v55 = vsub.f32 %v952_v12, %v310_v50  ;;  %v1119_v9 = vsub.f32 %v955_v13, %v311_v51  ;;  %v412_v58 = vsel %vm206_vm0, %v372_v54, 0.0  ;;  %v415_v63 = vsel %vm206_vm0, %v373_v8, 0.0 }
  0xa9   : > { %410 = vadd.xlane.f32.xlu1 %v409_v47  ;;  %413 = vadd.xlane.f32.xlu0 %v412_v58  ;;  %v233_v59 = vpop.xlane.xlu0 %232  ;;  %v236_v62 = vpop.xlane.xlu1 %235 }
  0xaa   : > { %v312_v3 = vmul.f32 0.015625, %v233_v59  ;;  %v313_v4 = vmul.f32 0.015625, %v236_v62  ;;  %v374_v6 = vmul.f32 %v1116_v55, %v1116_v55  ;;  %v375_v12 = vmul.f32 %v1119_v9, %v1119_v9 }
  0xac   : > { %v1128_v7 = vsub.f32 %v962_v16, %v312_v3  ;;  %v1131_v13 = vsub.f32 %v965_v17, %v313_v4  ;;  %v418_v14 = vsel %vm206_vm0, %v374_v6, 0.0  ;;  %v421_v19 = vsel %vm206_vm0, %v375_v12, 0.0 }
  0xad   : > { %416 = vadd.xlane.f32.xlu1 %v415_v63  ;;  %419 = vadd.xlane.f32.xlu0 %v418_v14  ;;  %v239_v15 = vpop.xlane.xlu0 %238  ;;  %v242_v18 = vpop.xlane.xlu1 %241 }
  0xae   : > { %v314_v22 = vmul.f32 0.015625, %v239_v15  ;;  %v315_v23 = vmul.f32 0.015625, %v242_v18  ;;  %v376_v0 = vmul.f32 %v1128_v7, %v1128_v7  ;;  %v377_v16 = vmul.f32 %v1131_v13, %v1131_v13 }
  0xb0   : > { %v1140_v1 = vsub.f32 %v972_v20, %v314_v22  ;;  %v1143_v17 = vsub.f32 %v975_v21, %v315_v23  ;;  %v424_v30 = vsel %vm206_vm0, %v376_v0, 0.0  ;;  %v427_v35 = vsel %vm206_vm0, %v377_v16, 0.0 }
  0xb1   : > { %422 = vadd.xlane.f32.xlu1 %v421_v19  ;;  %425 = vadd.xlane.f32.xlu0 %v424_v30  ;;  %v245_v31 = vpop.xlane.xlu0 %244  ;;  %v248_v34 = vpop.xlane.xlu1 %247 }
  0xb2   : > { %v316_v38 = vmul.f32 0.015625, %v245_v31  ;;  %v317_v39 = vmul.f32 0.015625, %v248_v34  ;;  %v378_v42 = vmul.f32 %v1140_v1, %v1140_v1  ;;  %v379_v20 = vmul.f32 %v1143_v17, %v1143_v17 }
  0xb4   : > { %v1152_v43 = vsub.f32 %v982_v24, %v316_v38  ;;  %v1155_v21 = vsub.f32 %v985_v25, %v317_v39  ;;  %v430_v46 = vsel %vm206_vm0, %v378_v42, 0.0  ;;  %v433_v51 = vsel %vm206_vm0, %v379_v20, 0.0 }
  0xb5   : > { %428 = vadd.xlane.f32.xlu1 %v427_v35  ;;  %431 = vadd.xlane.f32.xlu0 %v430_v46  ;;  %v251_v47 = vpop.xlane.xlu0 %250  ;;  %v254_v50 = vpop.xlane.xlu1 %253 }
  0xb6   : > { %v318_v54 = vmul.f32 0.015625, %v251_v47  ;;  %v319_v8 = vmul.f32 0.015625, %v254_v50  ;;  %v380_v58 = vmul.f32 %v1152_v43, %v1152_v43  ;;  %v381_v24 = vmul.f32 %v1155_v21, %v1155_v21 }
  0xb8   : > { %v1164_v59 = vsub.f32 %v992_v28, %v318_v54  ;;  %v1167_v25 = vsub.f32 %v995_v29, %v319_v8  ;;  %v436_v62 = vsel %vm206_vm0, %v380_v58, 0.0  ;;  %v439_v4 = vsel %vm206_vm0, %v381_v24, 0.0 }
  0xb9   : > { %434 = vadd.xlane.f32.xlu1 %v433_v51  ;;  %437 = vadd.xlane.f32.xlu0 %v436_v62  ;;  %v257_v63 = vpop.xlane.xlu0 %256  ;;  %v260_v3 = vpop.xlane.xlu1 %259 }
  0xba   : > { %v320_v6 = vmul.f32 0.015625, %v257_v63  ;;  %v321_v12 = vmul.f32 0.015625, %v260_v3  ;;  %v382_v14 = vmul.f32 %v1164_v59, %v1164_v59  ;;  %v383_v28 = vmul.f32 %v1167_v25, %v1167_v25 }
  0xbc   : > { %v1176_v15 = vsub.f32 %v1002_v32, %v320_v6  ;;  %v1179_v29 = vsub.f32 %v1005_v33, %v321_v12  ;;  %v442_v18 = vsel %vm206_vm0, %v382_v14, 0.0  ;;  %v445_v23 = vsel %vm206_vm0, %v383_v28, 0.0 }
  0xbd   : > { %440 = vadd.xlane.f32.xlu1 %v439_v4  ;;  %443 = vadd.xlane.f32.xlu0 %v442_v18  ;;  %v263_v19 = vpop.xlane.xlu0 %262  ;;  %v266_v22 = vpop.xlane.xlu1 %265 }
  0xbe   : > { %v322_v0 = vmul.f32 0.015625, %v263_v19  ;;  %v323_v16 = vmul.f32 0.015625, %v266_v22  ;;  %v384_v30 = vmul.f32 %v1176_v15, %v1176_v15  ;;  %v385_v32 = vmul.f32 %v1179_v29, %v1179_v29 }
  0xc0   : > { %v1188_v31 = vsub.f32 %v1012_v36, %v322_v0  ;;  %v1191_v33 = vsub.f32 %v1015_v37, %v323_v16  ;;  %v448_v34 = vsel %vm206_vm0, %v384_v30, 0.0  ;;  %v451_v39 = vsel %vm206_vm0, %v385_v32, 0.0 }
  0xc1   : > { %446 = vadd.xlane.f32.xlu1 %v445_v23  ;;  %449 = vadd.xlane.f32.xlu0 %v448_v34  ;;  %v269_v35 = vpop.xlane.xlu0 %268  ;;  %v272_v38 = vpop.xlane.xlu1 %271 }
  0xc2   : > { %v324_v42 = vmul.f32 0.015625, %v269_v35  ;;  %v325_v20 = vmul.f32 0.015625, %v272_v38  ;;  %v386_v46 = vmul.f32 %v1188_v31, %v1188_v31  ;;  %v387_v36 = vmul.f32 %v1191_v33, %v1191_v33 }
  0xc4   : > { %v1200_v47 = vsub.f32 %v1022_v40, %v324_v42  ;;  %v1203_v37 = vsub.f32 %v1025_v41, %v325_v20  ;;  %v454_v50 = vsel %vm206_vm0, %v386_v46, 0.0  ;;  %v457_v8 = vsel %vm206_vm0, %v387_v36, 0.0 }
  0xc5   : > { %452 = vadd.xlane.f32.xlu1 %v451_v39  ;;  %455 = vadd.xlane.f32.xlu0 %v454_v50  ;;  %v275_v51 = vpop.xlane.xlu0 %274  ;;  %v278_v54 = vpop.xlane.xlu1 %277 }
  0xc6   : > { %v326_v58 = vmul.f32 0.015625, %v275_v51  ;;  %v327_v24 = vmul.f32 0.015625, %v278_v54  ;;  %v388_v62 = vmul.f32 %v1200_v47, %v1200_v47  ;;  %v389_v40 = vmul.f32 %v1203_v37, %v1203_v37 }
  0xc8   : > { %v1212_v63 = vsub.f32 %v1032_v44, %v326_v58  ;;  %v1215_v41 = vsub.f32 %v1035_v45, %v327_v24  ;;  %v460_v3 = vsel %vm206_vm0, %v388_v62, 0.0  ;;  %v463_v12 = vsel %vm206_vm0, %v389_v40, 0.0 }
  0xc9   : > { %458 = vadd.xlane.f32.xlu1 %v457_v8  ;;  %461 = vadd.xlane.f32.xlu0 %v460_v3  ;;  %v281_v4 = vpop.xlane.xlu0 %280  ;;  %v284_v6 = vpop.xlane.xlu1 %283 }
  0xca   : > { %v328_v14 = vmul.f32 0.015625, %v281_v4  ;;  %v329_v28 = vmul.f32 0.015625, %v284_v6  ;;  %v390_v18 = vmul.f32 %v1212_v63, %v1212_v63  ;;  %v391_v44 = vmul.f32 %v1215_v41, %v1215_v41 }
  0xcc   : > { %v1224_v19 = vsub.f32 %v1042_v48, %v328_v14  ;;  %v1227_v45 = vsub.f32 %v1045_v49, %v329_v28  ;;  %v466_v22 = vsel %vm206_vm0, %v390_v18, 0.0  ;;  %v469_v16 = vsel %vm206_vm0, %v391_v44, 0.0 }
  0xcd   : > { %464 = vadd.xlane.f32.xlu1 %v463_v12  ;;  %467 = vadd.xlane.f32.xlu0 %v466_v22  ;;  %v287_v23 = vpop.xlane.xlu0 %286  ;;  %v290_v0 = vpop.xlane.xlu1 %289 }
  0xce   : > { %v330_v30 = vmul.f32 0.015625, %v287_v23  ;;  %v331_v32 = vmul.f32 0.015625, %v290_v0  ;;  %v392_v34 = vmul.f32 %v1224_v19, %v1224_v19  ;;  %v393_v48 = vmul.f32 %v1227_v45, %v1227_v45 }
  0xd0   : > { %v1236_v35 = vsub.f32 %v1052_v52, %v330_v30  ;;  %v1239_v49 = vsub.f32 %v1055_v53, %v331_v32  ;;  %v472_v38 = vsel %vm206_vm0, %v392_v34, 0.0  ;;  %v475_v20 = vsel %vm206_vm0, %v393_v48, 0.0 }
  0xd1   : > { %470 = vadd.xlane.f32.xlu1 %v469_v16  ;;  %473 = vadd.xlane.f32.xlu0 %v472_v38  ;;  %v293_v39 = vpop.xlane.xlu0 %292  ;;  %v296_v42 = vpop.xlane.xlu1 %295 }
  0xd2   : > { %v332_v46 = vmul.f32 0.015625, %v293_v39  ;;  %v333_v36 = vmul.f32 0.015625, %v296_v42  ;;  %v394_v50 = vmul.f32 %v1236_v35, %v1236_v35  ;;  %v395_v52 = vmul.f32 %v1239_v49, %v1239_v49 }
  0xd4   : > { %v1248_v51 = vsub.f32 %v1062_v56, %v332_v46  ;;  %v1251_v53 = vsub.f32 %v1065_v57, %v333_v36  ;;  %v478_v54 = vsel %vm206_vm0, %v394_v50, 0.0  ;;  %v481_v24 = vsel %vm206_vm0, %v395_v52, 0.0 }
  0xd5   : > { %476 = vadd.xlane.f32.xlu1 %v475_v20  ;;  %479 = vadd.xlane.f32.xlu0 %v478_v54  ;;  %v299_v8 = vpop.xlane.xlu0 %298  ;;  %v302_v58 = vpop.xlane.xlu1 %301 }
  0xd6   : > { %v334_v62 = vmul.f32 0.015625, %v299_v8  ;;  %v335_v40 = vmul.f32 0.015625, %v302_v58  ;;  %v396_v3 = vmul.f32 %v1248_v51, %v1248_v51  ;;  %v397_v56 = vmul.f32 %v1251_v53, %v1251_v53 }
  0xd8   : > { %v1260_v4 = vsub.f32 %v1072_v60, %v334_v62  ;;  %v1263_v57 = vsub.f32 %v1075_v61, %v335_v40  ;;  %v484_v6 = vsel %vm206_vm0, %v396_v3, 0.0  ;;  %v487_v12 = vsel %vm206_vm0, %v397_v56, 0.0 }
  0xd9   : > { %482 = vadd.xlane.f32.xlu1 %v481_v24  ;;  %485 = vadd.xlane.f32.xlu0 %v484_v6  ;;  %v1276_v6 = vld [vmem:[%s1454_s1] ss:$0 sm:$0xff] }
  0xda   : > { %v398_v14 = vmul.f32 %v1260_v4, %v1260_v4  ;;  %v399_v28 = vmul.f32 %v1263_v57, %v1263_v57 }
  0xdc   : > { %v490_v18 = vsel %vm206_vm0, %v398_v14, 0.0  ;;  %v493_v60 = vsel %vm206_vm0, %v399_v28, 0.0 }
  0xdd   : > { %488 = vadd.xlane.f32.xlu1 %v487_v12  ;;  %491 = vadd.xlane.f32.xlu0 %v490_v18  ;;  %v1282_v18 = vld [vmem:[%s1455_s2] ss:$0 sm:$0xff] }
  0xe1   : > { %494 = vadd.xlane.f32.xlu1 %v493_v60 }
 0x12a   : > { %v402_v61 = vpop.xlane.xlu0 %401 }
 0x12b   : > { %v496_v44 = vmul.f32 0.015625, %v402_v61 }
 0x12d   : > { %v528_v22 = vadd.f32 1e-05, %v496_v44 }
 0x12e   : > { %v405_v23 = vpop.xlane.xlu1 %404  ;;  %v408_v0 = vpop.xlane.xlu0 %407 }
 0x12f   : > { %811 = vrsqrt.f32 %v528_v22  ;;  %v497_v16 = vmul.f32 0.015625, %v405_v23  ;;  %v498_v30 = vmul.f32 0.015625, %v408_v0 }
 0x131   : > { %v529_v32 = vadd.f32 1e-05, %v497_v16  ;;  %v530_v34 = vadd.f32 1e-05, %v498_v30 }
 0x132   : > { %v411_v48 = vpop.xlane.xlu1 %410  ;;  %v414_v38 = vpop.xlane.xlu0 %413 }
 0x133   : > { %813 = vrsqrt.f32 %v529_v32  ;;  %v499_v39 = vmul.f32 0.015625, %v411_v48  ;;  %v500_v42 = vmul.f32 0.015625, %v414_v38 }
 0x134   : > { %815 = vrsqrt.f32 %v530_v34 }
 0x135   : > { %v531_v20 = vadd.f32 1e-05, %v499_v39  ;;  %v532_v46 = vadd.f32 1e-05, %v500_v42 }
 0x136   : > { %v417_v36 = vpop.xlane.xlu1 %416  ;;  %v420_v50 = vpop.xlane.xlu0 %419 }
 0x137   : > { %817 = vrsqrt.f32 %v531_v20  ;;  %v501_v52 = vmul.f32 0.015625, %v417_v36  ;;  %v502_v54 = vmul.f32 0.015625, %v420_v50 }
 0x138   : > { %819 = vrsqrt.f32 %v532_v46 }
 0x139   : > { %v533_v8 = vadd.f32 1e-05, %v501_v52  ;;  %v534_v58 = vadd.f32 1e-05, %v502_v54 }
 0x13a   : > { %v423_v24 = vpop.xlane.xlu1 %422  ;;  %v426_v62 = vpop.xlane.xlu0 %425 }
 0x13b   : > { %821 = vrsqrt.f32 %v533_v8  ;;  %v503_v40 = vmul.f32 0.015625, %v423_v24  ;;  %v504_v3 = vmul.f32 0.015625, %v426_v62 }
 0x13c   : > { %v812_v56 = vpop.eup %811  ;;  %823 = vrsqrt.f32 %v534_v58 }
 0x13d   : > { %v592_v12 = vmul.f32 %v812_v56, %v1082_v10  ;;  %v535_v14 = vadd.f32 1e-05, %v503_v40  ;;  %v536_v28 = vadd.f32 1e-05, %v504_v3 }
 0x13e   : > { %v429_v60 = vpop.xlane.xlu1 %428  ;;  %v432_v61 = vpop.xlane.xlu0 %431 }
 0x13f   : > { %v631_v44 = vmul.f32 %v1276_v6, %v592_v12  ;;  %825 = vrsqrt.f32 %v535_v14  ;;  %v505_v22 = vmul.f32 0.015625, %v429_v60  ;;  %v506_v23 = vmul.f32 0.015625, %v432_v61 }
 0x140   : > { %v814_v0 = vpop.eup %813  ;;  %827 = vrsqrt.f32 %v536_v28 }
 0x141   : > { %v816_v10 = vpop.eup %815  ;;  %v670_v16 = vadd.f32 %v1282_v18, %v631_v44  ;;  %v593_v30 = vmul.f32 %v814_v0, %v1092_v26  ;;  %v537_v32 = vadd.f32 1e-05, %v505_v22  ;;  %v538_v34 = vadd.f32 1e-05, %v506_v23 }
 0x142   : > { %v594_v48 = vmul.f32 %v816_v10, %v1085_v11  ;;  %v435_v38 = vpop.xlane.xlu1 %434  ;;  %v438_v39 = vpop.xlane.xlu0 %437 }
 0x143   : > { %702 = vst.msk [vmem:[%s1290_s25] sm:$0xff] %vm206_vm0, %v670_v16  ;;  %v632_v42 = vmul.f32 %v1276_v6, %v593_v30  ;;  %829 = vrsqrt.f32 %v537_v32  ;;  %v507_v20 = vmul.f32 0.015625, %v435_v38  ;;  %v508_v46 = vmul.f32 0.015625, %v438_v39 }
 0x144   : > { %v818_v36 = vpop.eup %817  ;;  %v633_v50 = vmul.f32 %v1276_v6, %v594_v48  ;;  %831 = vrsqrt.f32 %v538_v34 }
 0x145   : > { %v820_v26 = vpop.eup %819  ;;  %v671_v52 = vadd.f32 %v1282_v18, %v632_v42  ;;  %v595_v11 = vmul.f32 %v818_v36, %v1095_v27  ;;  %v539_v54 = vadd.f32 1e-05, %v507_v20  ;;  %v540_v8 = vadd.f32 1e-05, %v508_v46 }
 0x146   : > { %v672_v58 = vadd.f32 %v1282_v18, %v633_v50  ;;  %v596_v24 = vmul.f32 %v820_v26, %v1104_v2  ;;  %v441_v62 = vpop.xlane.xlu1 %440  ;;  %v444_v40 = vpop.xlane.xlu0 %443 }
 0x147   : > { %703 = vst.msk [vmem:[%s1290_s25 + $0x8] sm:$0xff] %vm206_vm0, %v671_v52  ;;  %v634_v3 = vmul.f32 %v1276_v6, %v595_v11  ;;  %833 = vrsqrt.f32 %v539_v54  ;;  %v509_v56 = vmul.f32 0.015625, %v441_v62  ;;  %v510_v12 = vmul.f32 0.015625, %v444_v40 }
 0x148   : > { %v822_v14 = vpop.eup %821  ;;  %704 = vst.msk [vmem:[%s1290_s25 + $0x10] sm:$0xff] %vm206_vm0, %v672_v58  ;;  %v635_v27 = vmul.f32 %v1276_v6, %v596_v24  ;;  %835 = vrsqrt.f32 %v540_v8 }
 0x149   : > { %v824_v28 = vpop.eup %823  ;;  %v673_v2 = vadd.f32 %v1282_v18, %v634_v3  ;;  %v597_v60 = vmul.f32 %v822_v14, %v1107_v5  ;;  %v541_v61 = vadd.f32 1e-05, %v509_v56  ;;  %v542_v44 = vadd.f32 1e-05, %v510_v12 }
 0x14a   : > { %v674_v22 = vadd.f32 %v1282_v18, %v635_v27  ;;  %v598_v23 = vmul.f32 %v824_v28, %v1116_v55  ;;  %v447_v0 = vpop.xlane.xlu1 %446  ;;  %v450_v10 = vpop.xlane.xlu0 %449 }
 0x14b   : > { %705 = vst.msk [vmem:[%s1290_s25 + $0x18] sm:$0xff] %vm206_vm0, %v673_v2  ;;  %v636_v16 = vmul.f32 %v1276_v6, %v597_v60  ;;  %837 = vrsqrt.f32 %v541_v61  ;;  %v511_v30 = vmul.f32 0.015625, %v447_v0  ;;  %v512_v32 = vmul.f32 0.015625, %v450_v10 }
 0x14c   : > { %v826_v34 = vpop.eup %825  ;;  %706 = vst.msk [vmem:[%s1290_s25 + $0x20] sm:$0xff] %vm206_vm0, %v674_v22  ;;  %v637_v5 = vmul.f32 %v1276_v6, %v598_v23  ;;  %839 = vrsqrt.f32 %v542_v44 }
 0x14d   : > { %v828_v48 = vpop.eup %827  ;;  %v675_v55 = vadd.f32 %v1282_v18, %v636_v16  ;;  %v599_v38 = vmul.f32 %v826_v34, %v1119_v9  ;;  %v543_v39 = vadd.f32 1e-05, %v511_v30  ;;  %v544_v42 = vadd.f32 1e-05, %v512_v32 }
 0x14e   : > { %v676_v20 = vadd.f32 %v1282_v18, %v637_v5  ;;  %v600_v46 = vmul.f32 %v828_v48, %v1128_v7  ;;  %v453_v36 = vpop.xlane.xlu1 %452  ;;  %v456_v50 = vpop.xlane.xlu0 %455 }
 0x14f   : > { %707 = vst.msk [vmem:[%s1290_s25 + $0x28] sm:$0xff] %vm206_vm0, %v675_v55  ;;  %v638_v26 = vmul.f32 %v1276_v6, %v599_v38  ;;  %841 = vrsqrt.f32 %v543_v39  ;;  %v513_v52 = vmul.f32 0.015625, %v453_v36  ;;  %v514_v11 = vmul.f32 0.015625, %v456_v50 }
 0x150   : > { %v830_v54 = vpop.eup %829  ;;  %708 = vst.msk [vmem:[%s1290_s25 + $0x30] sm:$0xff] %vm206_vm0, %v676_v20  ;;  %v639_v9 = vmul.f32 %v1276_v6, %v600_v46  ;;  %843 = vrsqrt.f32 %v544_v42 }
 0x151   : > { %v832_v8 = vpop.eup %831  ;;  %v677_v7 = vadd.f32 %v1282_v18, %v638_v26  ;;  %v601_v58 = vmul.f32 %v830_v54, %v1131_v13  ;;  %v545_v24 = vadd.f32 1e-05, %v513_v52  ;;  %v546_v62 = vadd.f32 1e-05, %v514_v11 }
 0x152   : > { %v678_v40 = vadd.f32 %v1282_v18, %v639_v9  ;;  %v602_v3 = vmul.f32 %v832_v8, %v1140_v1  ;;  %v459_v56 = vpop.xlane.xlu1 %458  ;;  %v462_v12 = vpop.xlane.xlu0 %461 }
 0x153   : > { %709 = vst.msk [vmem:[%s1290_s25 + $0x38] sm:$0xff] %vm206_vm0, %v677_v7  ;;  %v640_v14 = vmul.f32 %v1276_v6, %v601_v58  ;;  %845 = vrsqrt.f32 %v545_v24  ;;  %v515_v27 = vmul.f32 0.015625, %v459_v56  ;;  %v516_v28 = vmul.f32 0.015625, %v462_v12 }
 0x154   : > { %v834_v2 = vpop.eup %833  ;;  %710 = vst.msk [vmem:[%s1290_s25 + $0x40] sm:$0xff] %vm206_vm0, %v678_v40  ;;  %v641_v13 = vmul.f32 %v1276_v6, %v602_v3  ;;  %847 = vrsqrt.f32 %v546_v62 }
 0x155   : > { %v836_v60 = vpop.eup %835  ;;  %v679_v1 = vadd.f32 %v1282_v18, %v640_v14  ;;  %v603_v61 = vmul.f32 %v834_v2, %v1143_v17  ;;  %v547_v44 = vadd.f32 1e-05, %v515_v27  ;;  %v548_v22 = vadd.f32 1e-05, %v516_v28 }
 0x156   : > { %v680_v23 = vadd.f32 %v1282_v18, %v641_v13  ;;  %v604_v0 = vmul.f32 %v836_v60, %v1152_v43  ;;  %v465_v10 = vpop.xlane.xlu1 %464  ;;  %v468_v16 = vpop.xlane.xlu0 %467 }
 0x157   : > { %711 = vst.msk [vmem:[%s1290_s25 + $0x48] sm:$0xff] %vm206_vm0, %v679_v1  ;;  %v642_v30 = vmul.f32 %v1276_v6, %v603_v61  ;;  %849 = vrsqrt.f32 %v547_v44  ;;  %v517_v32 = vmul.f32 0.015625, %v465_v10  ;;  %v518_v34 = vmul.f32 0.015625, %v468_v16 }
 0x158   : > { %v838_v5 = vpop.eup %837  ;;  %712 = vst.msk [vmem:[%s1290_s25 + $0x50] sm:$0xff] %vm206_vm0, %v680_v23  ;;  %v643_v17 = vmul.f32 %v1276_v6, %v604_v0  ;;  %851 = vrsqrt.f32 %v548_v22 }
 0x159   : > { %v840_v48 = vpop.eup %839  ;;  %v681_v43 = vadd.f32 %v1282_v18, %v642_v30  ;;  %v605_v55 = vmul.f32 %v838_v5, %v1155_v21  ;;  %v549_v38 = vadd.f32 1e-05, %v517_v32  ;;  %v550_v39 = vadd.f32 1e-05, %v518_v34 }
 0x15a   : > { %v682_v42 = vadd.f32 %v1282_v18, %v643_v17  ;;  %v606_v20 = vmul.f32 %v840_v48, %v1164_v59  ;;  %v471_v46 = vpop.xlane.xlu1 %470  ;;  %v474_v36 = vpop.xlane.xlu0 %473 }
 0x15b   : > { %713 = vst.msk [vmem:[%s1290_s25 + $0x58] sm:$0xff] %vm206_vm0, %v681_v43  ;;  %v644_v50 = vmul.f32 %v1276_v6, %v605_v55  ;;  %853 = vrsqrt.f32 %v549_v38  ;;  %v519_v26 = vmul.f32 0.015625, %v471_v46  ;;  %v520_v52 = vmul.f32 0.015625, %v474_v36 }
 0x15c   : > { %v842_v11 = vpop.eup %841  ;;  %714 = vst.msk [vmem:[%s1290_s25 + $0x60] sm:$0xff] %vm206_vm0, %v682_v42  ;;  %v645_v21 = vmul.f32 %v1276_v6, %v606_v20  ;;  %855 = vrsqrt.f32 %v550_v39 }
 0x15d   : > { %v844_v54 = vpop.eup %843  ;;  %v683_v59 = vadd.f32 %v1282_v18, %v644_v50  ;;  %v607_v9 = vmul.f32 %v842_v11, %v1167_v25  ;;  %v551_v8 = vadd.f32 1e-05, %v519_v26  ;;  %v552_v7 = vadd.f32 1e-05, %v520_v52 }
 0x15e   : > { %v684_v58 = vadd.f32 %v1282_v18, %v645_v21  ;;  %v608_v24 = vmul.f32 %v844_v54, %v1176_v15  ;;  %v477_v62 = vpop.xlane.xlu1 %476  ;;  %v480_v40 = vpop.xlane.xlu0 %479 }
 0x15f   : > { %715 = vst.msk [vmem:[%s1290_s25 + $0x68] sm:$0xff] %vm206_vm0, %v683_v59  ;;  %v646_v3 = vmul.f32 %v1276_v6, %v607_v9  ;;  %857 = vrsqrt.f32 %v551_v8  ;;  %v521_v56 = vmul.f32 0.015625, %v477_v62  ;;  %v522_v12 = vmul.f32 0.015625, %v480_v40 }
 0x160   : > { %v846_v14 = vpop.eup %845  ;;  %716 = vst.msk [vmem:[%s1290_s25 + $0x70] sm:$0xff] %vm206_vm0, %v684_v58  ;;  %v647_v25 = vmul.f32 %v1276_v6, %v608_v24  ;;  %859 = vrsqrt.f32 %v552_v7 }
 0x161   : > { %v848_v27 = vpop.eup %847  ;;  %v685_v15 = vadd.f32 %v1282_v18, %v646_v3  ;;  %v609_v28 = vmul.f32 %v846_v14, %v1179_v29  ;;  %v553_v2 = vadd.f32 1e-05, %v521_v56  ;;  %v554_v13 = vadd.f32 1e-05, %v522_v12 }
 0x162   : > { %v686_v60 = vadd.f32 %v1282_v18, %v647_v25  ;;  %v610_v1 = vmul.f32 %v848_v27, %v1188_v31  ;;  %v483_v61 = vpop.xlane.xlu1 %482  ;;  %v486_v44 = vpop.xlane.xlu0 %485 }
 0x163   : > { %717 = vst.msk [vmem:[%s1290_s25 + $0x78] sm:$0xff] %vm206_vm0, %v685_v15  ;;  %v648_v22 = vmul.f32 %v1276_v6, %v609_v28  ;;  %861 = vrsqrt.f32 %v553_v2  ;;  %v523_v23 = vmul.f32 0.015625, %v483_v61  ;;  %v524_v0 = vmul.f32 0.015625, %v486_v44 }
 0x164   : > { %v850_v10 = vpop.eup %849  ;;  %718 = vst.msk [vmem:[%s1290_s25 + $0x80] sm:$0xff] %vm206_vm0, %v686_v60  ;;  %v649_v29 = vmul.f32 %v1276_v6, %v610_v1  ;;  %863 = vrsqrt.f32 %v554_v13 }
 0x165   : > { %v852_v16 = vpop.eup %851  ;;  %v687_v31 = vadd.f32 %v1282_v18, %v648_v22  ;;  %v611_v30 = vmul.f32 %v850_v10, %v1191_v33  ;;  %v555_v32 = vadd.f32 1e-05, %v523_v23  ;;  %v556_v34 = vadd.f32 1e-05, %v524_v0 }
 0x166   : > { %v688_v5 = vadd.f32 %v1282_v18, %v649_v29  ;;  %v612_v17 = vmul.f32 %v852_v16, %v1200_v47  ;;  %v489_v48 = vpop.xlane.xlu1 %488  ;;  %v492_v43 = vpop.xlane.xlu0 %491 }
 0x167   : > { %719 = vst.msk [vmem:[%s1290_s25 + $0x88] sm:$0xff] %vm206_vm0, %v687_v31  ;;  %v650_v55 = vmul.f32 %v1276_v6, %v611_v30  ;;  %865 = vrsqrt.f32 %v555_v32  ;;  %v525_v38 = vmul.f32 0.015625, %v489_v48  ;;  %v526_v39 = vmul.f32 0.015625, %v492_v43 }
 0x168   : > { %v854_v42 = vpop.eup %853  ;;  %720 = vst.msk [vmem:[%s1290_s25 + $0x90] sm:$0xff] %vm206_vm0, %v688_v5  ;;  %v651_v33 = vmul.f32 %v1276_v6, %v612_v17  ;;  %867 = vrsqrt.f32 %v556_v34 }
 0x169   : > { %v856_v20 = vpop.eup %855  ;;  %v689_v47 = vadd.f32 %v1282_v18, %v650_v55  ;;  %v613_v46 = vmul.f32 %v854_v42, %v1203_v37  ;;  %v557_v36 = vadd.f32 1e-05, %v525_v38  ;;  %v558_v50 = vadd.f32 1e-05, %v526_v39 }
 0x16a   : > { %v690_v26 = vadd.f32 %v1282_v18, %v651_v33  ;;  %v614_v52 = vmul.f32 %v856_v20, %v1212_v63  ;;  %v495_v11 = vpop.xlane.xlu1 %494 }
 0x16b   : > { %721 = vst.msk [vmem:[%s1290_s25 + $0x98] sm:$0xff] %vm206_vm0, %v689_v47  ;;  %v652_v21 = vmul.f32 %v1276_v6, %v613_v46  ;;  %869 = vrsqrt.f32 %v557_v36  ;;  %v527_v54 = vmul.f32 0.015625, %v495_v11 }
 0x16c   : > { %v858_v59 = vpop.eup %857  ;;  %722 = vst.msk [vmem:[%s1290_s25 + $0xa0] sm:$0xff] %vm206_vm0, %v690_v26  ;;  %v653_v37 = vmul.f32 %v1276_v6, %v614_v52  ;;  %871 = vrsqrt.f32 %v558_v50 }
 0x16d   : > { %v860_v9 = vpop.eup %859  ;;  %v691_v8 = vadd.f32 %v1282_v18, %v652_v21  ;;  %v615_v63 = vmul.f32 %v858_v59, %v1215_v41  ;;  %v559_v7 = vadd.f32 1e-05, %v527_v54 }
 0x16e   : > { %v692_v58 = vadd.f32 %v1282_v18, %v653_v37  ;;  %v616_v24 = vmul.f32 %v860_v9, %v1224_v19 }
 0x16f   : > { %723 = vst.msk [vmem:[%s1290_s25 + $0xa8] sm:$0xff] %vm206_vm0, %v691_v8  ;;  %v654_v62 = vmul.f32 %v1276_v6, %v615_v63  ;;  %873 = vrsqrt.f32 %v559_v7 }
 0x170   : > { %v862_v40 = vpop.eup %861  ;;  %724 = vst.msk [vmem:[%s1290_s25 + $0xb0] sm:$0xff] %vm206_vm0, %v692_v58  ;;  %v655_v3 = vmul.f32 %v1276_v6, %v616_v24 }
 0x171   : > { %v864_v56 = vpop.eup %863  ;;  %v693_v41 = vadd.f32 %v1282_v18, %v654_v62  ;;  %v617_v12 = vmul.f32 %v862_v40, %v1227_v45 }
 0x172   : > { %v694_v14 = vadd.f32 %v1282_v18, %v655_v3  ;;  %v618_v19 = vmul.f32 %v864_v56, %v1236_v35 }
 0x173   : > { %725 = vst.msk [vmem:[%s1290_s25 + $0xb8] sm:$0xff] %vm206_vm0, %v693_v41  ;;  %v656_v25 = vmul.f32 %v1276_v6, %v617_v12 }
 0x174   : > { %v866_v27 = vpop.eup %865  ;;  %726 = vst.msk [vmem:[%s1290_s25 + $0xc0] sm:$0xff] %vm206_vm0, %v694_v14  ;;  %v657_v15 = vmul.f32 %v1276_v6, %v618_v19 }
 0x175   : > { %v868_v28 = vpop.eup %867  ;;  %v695_v2 = vadd.f32 %v1282_v18, %v656_v25  ;;  %v619_v45 = vmul.f32 %v866_v27, %v1239_v49 }
 0x176   : > { %v696_v13 = vadd.f32 %v1282_v18, %v657_v15  ;;  %v620_v35 = vmul.f32 %v868_v28, %v1248_v51 }
 0x177   : > { %727 = vst.msk [vmem:[%s1290_s25 + $0xc8] sm:$0xff] %vm206_vm0, %v695_v2  ;;  %v658_v60 = vmul.f32 %v1276_v6, %v619_v45 }
 0x178   : > { %v870_v1 = vpop.eup %869  ;;  %728 = vst.msk [vmem:[%s1290_s25 + $0xd0] sm:$0xff] %vm206_vm0, %v696_v13  ;;  %v659_v61 = vmul.f32 %v1276_v6, %v620_v35 }
 0x179   : > { %v872_v44 = vpop.eup %871  ;;  %v697_v22 = vadd.f32 %v1282_v18, %v658_v60  ;;  %v621_v49 = vmul.f32 %v870_v1, %v1251_v53 }
 0x17a   : > { %v698_v23 = vadd.f32 %v1282_v18, %v659_v61  ;;  %v622_v51 = vmul.f32 %v872_v44, %v1260_v4 }
 0x17b   : > { %729 = vst.msk [vmem:[%s1290_s25 + $0xd8] sm:$0xff] %vm206_vm0, %v697_v22  ;;  %v660_v0 = vmul.f32 %v1276_v6, %v621_v49 }
 0x17c   : > { %v874_v10 = vpop.eup %873  ;;  %730 = vst.msk [vmem:[%s1290_s25 + $0xe0] sm:$0xff] %vm206_vm0, %v698_v23  ;;  %v661_v29 = vmul.f32 %v1276_v6, %v622_v51 }
 0x17d   : > { %v699_v16 = vadd.f32 %v1282_v18, %v660_v0  ;;  %v623_v31 = vmul.f32 %v874_v10, %v1263_v57 }
 0x17e   : > { %v700_v30 = vadd.f32 %v1282_v18, %v661_v29 }
 0x17f   : > { %731 = vst.msk [vmem:[%s1290_s25 + $0xe8] sm:$0xff] %vm206_vm0, %v699_v16  ;;  %v662_v53 = vmul.f32 %v1276_v6, %v623_v31 }
 0x180   : > { %732 = vst.msk [vmem:[%s1290_s25 + $0xf0] sm:$0xff] %vm206_vm0, %v700_v30 }
 0x181   : > { %v701_v4 = vadd.f32 %v1282_v18, %v662_v53 }
 0x183   : > { %733 = vst.msk [vmem:[%s1290_s25 + $0xf8] sm:$0xff] %vm206_vm0, %v701_v4 }
 0x184 PF: > { %s13_s12 = sadd.s32 1, %s881_s12  }
 0x185   : > { %p10_p4 = scmp.ge.s32.totalorder %s13_s12, 4  }
 0x187   :  { %12 = sbr.rel (!%p10_p4) target bundleno = 1 (0x1), region = 62 }

</bundles_post_ra>
